<compile_context>
chip_gen: v5e
topology: v5e:2x2
jax: 0.10.0
libtpu: 0.0.40
codegen_flags: <defaults>
</compile_context>

<pallas_src>
import functools
import math

import jax
import jax.numpy as jnp
from jax import lax
from jax.experimental import pallas as pl
from jax.experimental.pallas import tpu as pltpu


def _cdiv(a, b):
    return (a + b - 1) // b


def _round_up(a, b):
    return _cdiv(a, b) * b


def _sublane_multiple(dtype) -> int:
    # f32 -> 8, bf16 -> 16, int8/fp8 -> 32 (min sublane tiling per dtype).
    bits = jnp.dtype(dtype).itemsize * 8
    return max(8, 256 // bits)


def _vmem_capacity_bytes() -> int:
    try:
        info = pltpu.get_tpu_info()
        cap = getattr(info, "vmem_capacity_bytes", None)
        if cap:
            return int(cap)
    except Exception:
        pass
    return 64 * 1024 * 1024  # conservative default (v7x per-core physical VMEM)


# --------------------------------------------------------------------------- #
# Kernels
# --------------------------------------------------------------------------- #
def _embed_onehot_kernel(ids_ref, lut_ref, out_ref, *, scale, vocab):
    """Small-vocab path: one_hot(ids) @ lut on the MXU.

    ids_ref : VMEM (T, 1) int32        (blocked per grid step; no SMEM needed)
    lut_ref : VMEM (vocab, d_model)    (resident across the whole grid)
    out_ref : VMEM (T, d_model)        (single dense store)
    """
    ids = ids_ref[...]                                            # (T, 1)
    iota = lax.broadcasted_iota(jnp.int32, (ids.shape[0], vocab), 1)
    onehot = (iota == ids).astype(lut_ref.dtype)                  # (T, vocab)
    # HIGHEST precision keeps f32 tables exact (selection must not truncate
    # the rows to bf16); for bf16 tables this is the native matmul anyway.
    acc = jnp.dot(onehot, lut_ref[...],
                  preferred_element_type=jnp.float32,
                  precision=lax.Precision.HIGHEST)                # (T, d_model) f32
    out_ref[...] = (acc * scale).astype(out_ref.dtype)


def _embed_gather_kernel(ids_ref, lut_ref, out_ref, *, scale, block_tokens, group):
    """Resident-LUT grouped gather.

    ids_ref : SMEM (n_padded,) int32   (scalar-prefetched, flat)
    lut_ref : VMEM (vocab, d_model)    (resident across the whole grid)
    out_ref : VMEM (T, d_model)

    `group` = sublane multiple (8 for f32, 16 for bf16): one sublane-dense
    store and one vectorized scale/cast per group instead of per row.
    """
    base = pl.program_id(0) * block_tokens

    def body(g, carry):
        start = pl.multiple_of(g * group, group)
        rows = [lut_ref[pl.ds(ids_ref[base + start + j], 1), :]
                for j in range(group)]                            # group x (1, d_model)
        tile = jnp.concatenate(rows, axis=0).astype(jnp.float32)  # (group, d_model)
        out_ref[pl.ds(start, group), :] = (tile * scale).astype(out_ref.dtype)
        return carry

    lax.fori_loop(0, block_tokens // group, body, 0)


def _embed_hbm_gather_kernel(ids_ref, lut_hbm, out_ref, sem, *, scale, block_tokens):
    """HBM row-gather fallback (table does not fit VMEM).

    ids_ref : SMEM (n_padded,) int32   (scalar-prefetched, flat)
    lut_hbm : raw HBM ref (vocab, d_model)   (memory_space=pl.ANY)
    out_ref : VMEM (T, d_model)        (DMA destination; scaled in place)
    sem     : single shared DMA semaphore
    """
    base = pl.program_id(0) * block_tokens

    def row_copy(t):
        tok = ids_ref[base + t]
        # Rows land directly in the output tile: no row_buf, no extra pass.
        return pltpu.make_async_copy(
            lut_hbm.at[pl.ds(tok, 1), :],
            out_ref.at[pl.ds(t, 1), :],
            sem,
        )

    # Launch all T row gathers; they are all in flight simultaneously.
    def start(t, c):
        row_copy(t).start()
        return c
    lax.fori_loop(0, block_tokens, start, 0, unroll=4)

    # Wait using the exact same (src, dst, sem) descriptors that were started.
    def wait(t, c):
        row_copy(t).wait()
        return c
    lax.fori_loop(0, block_tokens, wait, 0, unroll=4)

    # One vectorized scale pass over the dense tile, in place.
    out_ref[...] = (out_ref[...].astype(jnp.float32) * scale).astype(out_ref.dtype)


# --------------------------------------------------------------------------- #
# pallas_call wrappers (one flat chunk of token ids)
# --------------------------------------------------------------------------- #
def _pallas_embed(ids, lut, *, block_tokens, path, vmem_cap):
    """ids: (n,) int32.  Returns (n, d_model) = lut[ids] * sqrt(d_model)."""
    vocab, d_model = lut.shape
    out_dtype = lut.dtype
    scale = float(math.sqrt(d_model))
    itemsize = jnp.dtype(lut.dtype).itemsize

    n = int(ids.shape[0])
    num_blocks = _cdiv(n, block_tokens)
    n_padded = num_blocks * block_tokens
    if n_padded != n:
        ids = jnp.pad(ids, (0, n_padded - n))          # id 0 is a valid row

    table_bytes = vocab * d_model * itemsize
    out_tile_bytes = block_tokens * d_model * itemsize
    out_bytes = n_padded * d_model * itemsize

    # The resident LUT never changes block (constant index_map); for big tables
    # single-buffer it so the resident window ~doubles (critical on v7x 64 MiB).
    single_buffer_lut = table_bytes > (4 << 20)
    lut_kwargs = dict(pipeline_mode=pl.Buffered(1)) if single_buffer_lut else {}
    lut_buf_bytes = table_bytes * (1 if single_buffer_lut else 2)

    def _vmem_limit(needed):
        # Leave headroom for Mosaic internal scratch; never request ~all of VMEM.
        return int(min(vmem_cap - (8 << 20), max(needed + (4 << 20), 32 << 20)))

    out_shape = jax.ShapeDtypeStruct((n_padded, d_model), out_dtype)
    out_spec_noprefetch = pl.BlockSpec((block_tokens, d_model), lambda i: (i, 0))
    out_spec_prefetch = pl.BlockSpec((block_tokens, d_model), lambda i, ids_s: (i, 0))

    if path == "onehot":
        needed = (lut_buf_bytes + 2 * out_tile_bytes
                  + block_tokens * vocab * itemsize + (2 << 20))
        cost = pl.CostEstimate(
            flops=2 * n_padded * vocab * d_model, transcendentals=0,
            bytes_accessed=table_bytes + out_bytes + n_padded * 4)
        out = pl.pallas_call(
            functools.partial(_embed_onehot_kernel, scale=scale, vocab=vocab),
            out_shape=out_shape,
            grid_spec=pltpu.PrefetchScalarGridSpec(
                num_scalar_prefetch=0,
                grid=(num_blocks,),
                in_specs=[
                    pl.BlockSpec((block_tokens, 1), lambda i: (i, 0)),      # ids
                    pl.BlockSpec((vocab, d_model), lambda i: (0, 0),        # LUT
                                 **lut_kwargs),
                ],
                out_specs=out_spec_noprefetch,
            ),
            compiler_params=pltpu.CompilerParams(
                dimension_semantics=("parallel",),
                vmem_limit_bytes=_vmem_limit(needed)),
            cost_estimate=cost,
        )(ids.reshape(n_padded, 1), lut)

    elif path == "gather":
        group = _sublane_multiple(lut.dtype)
        needed = lut_buf_bytes + 2 * out_tile_bytes + (2 << 20)
        cost = pl.CostEstimate(
            flops=n_padded * d_model, transcendentals=0,
            bytes_accessed=table_bytes + out_bytes + n_padded * 4)
        out = pl.pallas_call(
            functools.partial(_embed_gather_kernel, scale=scale,
                              block_tokens=block_tokens, group=group),
            out_shape=out_shape,
            grid_spec=pltpu.PrefetchScalarGridSpec(
                num_scalar_prefetch=1,                       # flat ids -> SMEM
                grid=(num_blocks,),
                in_specs=[
                    pl.BlockSpec((vocab, d_model), lambda i, ids_s: (0, 0),
                                 **lut_kwargs),
                ],
                out_specs=out_spec_prefetch,
            ),
            compiler_params=pltpu.CompilerParams(
                dimension_semantics=("parallel",),
                vmem_limit_bytes=_vmem_limit(needed)),
            cost_estimate=cost,
        )(ids, lut)

    elif path == "hbm":
        needed = 2 * out_tile_bytes + (2 << 20)
        cost = pl.CostEstimate(
            flops=n_padded * d_model, transcendentals=0,
            bytes_accessed=n_padded * d_model * itemsize + out_bytes + n_padded * 4)
        out = pl.pallas_call(
            functools.partial(_embed_hbm_gather_kernel, scale=scale,
                              block_tokens=block_tokens),
            out_shape=out_shape,
            grid_spec=pltpu.PrefetchScalarGridSpec(
                num_scalar_prefetch=1,                       # flat ids -> SMEM
                grid=(num_blocks,),
                in_specs=[pl.BlockSpec(memory_space=pl.ANY)],  # raw HBM table
                out_specs=out_spec_prefetch,
                scratch_shapes=[pltpu.SemaphoreType.DMA(())],
            ),
            compiler_params=pltpu.CompilerParams(
                dimension_semantics=("parallel",),
                vmem_limit_bytes=_vmem_limit(needed)),
            cost_estimate=cost,
        )(ids, lut)
    else:
        raise ValueError(f"unknown path: {path!r}")

    return out[:n]


# --------------------------------------------------------------------------- #
# Public forward
# --------------------------------------------------------------------------- #
def embeddings_forward(x, lut, *, block_tokens=None, path=None,
                       onehot_max_vocab=2048, max_prefetch_tokens=32768):
    """Pallas TPU forward of Embeddings: lut[x] * sqrt(d_model).

    path: None (auto) | "onehot" | "gather" | "hbm".
    """
    vocab, d_model = lut.shape
    lead_shape = tuple(int(s) for s in x.shape)
    n_tokens = int(math.prod(lead_shape)) if lead_shape else 1
    ids = x.reshape(n_tokens).astype(jnp.int32)

    itemsize = jnp.dtype(lut.dtype).itemsize
    sub = _sublane_multiple(lut.dtype)
    vmem_cap = _vmem_capacity_bytes()

    # Large tiles amortize per-grid-step overhead (memory-bound kernel), capped
    # so the double-buffered output tiles stay within a modest VMEM budget.
    if block_tokens is None:
        block_tokens = min(512, _round_up(max(n_tokens, 1), sub))
        while block_tokens > sub and 2 * block_tokens * d_model * itemsize > (24 << 20):
            block_tokens //= 2
    block_tokens = max(sub, _round_up(block_tokens, sub))

    # Path selection: residency check accounts for the (possibly single-
    # buffered) LUT plus the double-buffered output tiles, with headroom.
    table_bytes = vocab * d_model * itemsize
    out_tile_bytes = block_tokens * d_model * itemsize
    single_buffer_lut = table_bytes > (4 << 20)
    lut_buf_bytes = table_bytes * (1 if single_buffer_lut else 2)
    resident_budget = int(0.85 * (vmem_cap - (8 << 20)))
    resident_ok = (lut_buf_bytes + 2 * out_tile_bytes + (4 << 20)) <= resident_budget

    if path is None:
        if vocab <= onehot_max_vocab and resident_ok:
            path = "onehot"
        elif resident_ok:
            path = "gather"
        else:
            path = "hbm"

    if path == "onehot":
        # ids are a blocked VMEM input: no SMEM use, no chunking, single call.
        out_flat = _pallas_embed(ids, lut, block_tokens=block_tokens,
                                 path=path, vmem_cap=vmem_cap)
    else:
        # "gather"/"hbm" need scalar ids in SMEM (scalar prefetch, flat 1-D);
        # bound the per-call prefetch footprint as an SMEM safety valve
        # (one chunk for all typical sequence lengths).
        step = max(block_tokens, _round_up(max_prefetch_tokens, block_tokens))
        chunks = []
        for s0 in range(0, n_tokens, step):
            chunks.append(_pallas_embed(ids[s0:s0 + step], lut,
                                        block_tokens=block_tokens,
                                        path=path, vmem_cap=vmem_cap))
        out_flat = chunks[0] if len(chunks) == 1 else jnp.concatenate(chunks, axis=0)

    return out_flat.reshape(*lead_shape, d_model)


if __name__ == "__main__":
    # Small, deterministic setup consistent with the module.
    d_model = 32
    vocab = 64
    B, S = 2, 8

    key = jax.random.PRNGKey(0)
    k_lut, k_ids = jax.random.split(key)

    # nn.Embedding default init: weights ~ N(0, 1).
    lut = jax.random.normal(k_lut, (vocab, d_model), dtype=jnp.float32)
    x = jax.random.randint(k_ids, (B, S), 0, vocab, dtype=jnp.int32)

    # Pure-JAX reference.
    ref = lut[x] * math.sqrt(d_model)

    # Default (auto) path: small vocab -> resident LUT + one-hot matmul on MXU.
    out = jax.block_until_ready(embeddings_forward(x, lut))
    assert out.shape == (B, S, d_model)
    assert jnp.allclose(out, ref, atol=1e-4, rtol=1e-4)

    # Resident-LUT grouped-gather path (medium vocab), exercised explicitly.
    out_g = jax.block_until_ready(embeddings_forward(x, lut, path="gather"))
    assert jnp.allclose(out_g, ref, atol=1e-5, rtol=1e-5)

    # HBM row-gather fallback path (table too large for VMEM), exercised explicitly.
    out_h = jax.block_until_ready(embeddings_forward(x, lut, path="hbm"))
    assert jnp.allclose(out_h, ref, atol=1e-5, rtol=1e-5)

    print("KERNEL_OK")
</pallas_src>

<mosaic_0001>
module attributes {stable_mosaic.version = 11 : i64} {
  func.func @_embed_onehot_kernel(%arg0: i32, %arg1: memref<16x1xi32, #tpu.memory_space<vmem>>, %arg2: memref<64x32xf32, #tpu.memory_space<vmem>>, %arg3: memref<16x32xf32, #tpu.memory_space<vmem>>) attributes {dimension_semantics = [#tpu.dimension_semantics<parallel>], iteration_bounds = array<i64: 1>, scalar_prefetch = 0 : i64, scratch_operands = 0 : i64, tpu.core_type = #tpu.core_type<tc>, window_params = [{transform_indices = @transform_0, window_bounds = array<i64: 16, 1>}, {pipeline_mode = #tpu.pipeline_mode<synchronous>, transform_indices = @transform_1, window_bounds = array<i64: 64, 32>}, {transform_indices = @transform_2, window_bounds = array<i64: 16, 32>}]} {
    %c0 = arith.constant 0 : index
    %c0_0 = arith.constant 0 : index
    %0 = vector.load %arg1[%c0, %c0_0] : memref<16x1xi32, #tpu.memory_space<vmem>>, vector<16x1xi32>
    %1 = tpu.iota {dimensions = array<i32: 1>} : vector<16x64xi32>
    %2 = vector.broadcast %0 : vector<16x1xi32> to vector<16x64xi32>
    %3 = arith.cmpi eq, %1, %2 : vector<16x64xi32>
    %4 = arith.extui %3 : vector<16x64xi1> to vector<16x64xi32>
    %5 = arith.sitofp %4 : vector<16x64xi32> to vector<16x64xf32>
    %c0_1 = arith.constant 0 : index
    %c0_2 = arith.constant 0 : index
    %6 = vector.load %arg2[%c0_1, %c0_2] : memref<64x32xf32, #tpu.memory_space<vmem>>, vector<64x32xf32>
    %cst = arith.constant dense<0.000000e+00> : vector<16x32xf32>
    %7 = tpu.matmul %5, %6, %cst {dimension_numbers = #tpu.dot_dimension_numbers<[1], [0], [0], [1], [0, 0, 1, 1], [], []>, precision = #tpu.contract_precision<fp32>} : vector<16x64xf32>, vector<64x32xf32>, vector<16x32xf32> -> vector<16x32xf32>
    %cst_3 = arith.constant 5.65685415 : f32
    %8 = vector.broadcast %cst_3 : f32 to vector<16x32xf32>
    %9 = arith.mulf %7, %8 : vector<16x32xf32>
    %c0_4 = arith.constant 0 : index
    %c0_5 = arith.constant 0 : index
    %10 = vector.load %arg3[%c0_4, %c0_5] : memref<16x32xf32, #tpu.memory_space<vmem>>, vector<16x32xf32>
    tpu.vector_store %arg3[%c0_4, %c0_5], %9 {strides = array<i32>} : memref<16x32xf32, #tpu.memory_space<vmem>>, vector<16x32xf32>,
    return
  }
  func.func @transform_0(%arg0: i32) -> (i32, i32) {
    %c0_i32 = arith.constant 0 : i32
    %c0_i32_0 = arith.constant 0 : i32
    return %arg0, %c0_i32 : i32, i32
  }
  func.func @transform_1(%arg0: i32) -> (i32, i32) {
    %c0_i32 = arith.constant 0 : i32
    %c0_i32_0 = arith.constant 0 : i32
    %c0_i32_1 = arith.constant 0 : i32
    return %c0_i32, %c0_i32_0 : i32, i32
  }
  func.func @transform_2(%arg0: i32) -> (i32, i32) {
    %c0_i32 = arith.constant 0 : i32
    %c0_i32_0 = arith.constant 0 : i32
    return %arg0, %c0_i32 : i32, i32
  }
}

</mosaic_0001>

<bundles_post_ra>
// kernel: tpu_custom_call.1
= control target key start
LH: loop header
LB: loop body
LE: loop exit
PB: predicated region body
PF: predicated region fallthrough
CT: control target
= control target key end

     0   :  { %v390_v2 = vmov 0   ;;  %s510_s0 = inlined_call_operand.vmem [shape: s32[16,1], index: 0, kind: input, shape index: {}]   ;;  %s511_s1 = inlined_call_operand.vmem [shape: f32[64,32], index: 1, kind: input, shape index: {}]   ;;  %s512_s2 = inlined_call_operand.hbm [shape: f32[16,32], index: 2, kind: output, shape index: {}]  }
   0x1   :  { %v12_v0 = vld [vmem:[%s510_s0] sm:$0xff]  ;;  %v35_v1 = vld [vmem:[%s511_s1 + $0x38] sm:$0xff]  ;;  %363 = vset.pattern.permute.xlu0 %v390_v2  ;;  %v34_v4 = vld [vmem:[%s511_s1 + $0x30] sm:$0xff] }
   0x2   :  { %v416_v3 = vand.u32 4294901760, %v35_v1  ;;  %v33_v5 = vld [vmem:[%s511_s1 + $0x28] sm:$0xff]  ;;  %v32_v6 = vld [vmem:[%s511_s1 + $0x20] sm:$0xff]  ;;  %17 = vperm.xlu0 %363, %v12_v0   ;;  %v427_v7 = vand.u32 4294901760, %v34_v4  ;;  %v31_v10 = vld [vmem:[%s511_s1 + $0x18] sm:$0xff] }
   0x3   :  { %v429_v8 = vand.u32 4294901760, %v33_v5  ;;  %v431_v9 = vand.u32 4294901760, %v32_v6  ;;  %v30_v11 = vld [vmem:[%s511_s1 + $0x10] sm:$0xff]  ;;  %v29_v12 = vld [vmem:[%s511_s1 + $0x8] sm:$0xff]  ;;  %v444_v14 = vand.u32 4294901760, %v31_v10 }
   0x4   :  { %v93_v13 = vsub.f32 %v35_v1, %v416_v3  ;;  %201 = vmatpush.msra.mxu3 %v416_v3  ;;  %52 = vmatpush.msra.mxu0 %v416_v3  ;;  %v447_v15 = vand.u32 4294901760, %v30_v11  ;;  %v449_v16 = vand.u32 4294901760, %v29_v12 }
   0x5   :  { %7 = vsyncpa [#allocation3], 0  ;;  %v99_v17 = vsub.f32 %v34_v4, %v427_v7  ;;  %v105_v18 = vsub.f32 %v33_v5, %v429_v8  ;;  %v111_v19 = vsub.f32 %v32_v6, %v431_v9  ;;  %v117_v21 = vsub.f32 %v31_v10, %v444_v14  ;;  %v13_v26 = vld [vmem:[%s510_s0 + $0x8] sm:$0xff]  ;;  %v28_v45 = vld [vmem:[%s511_s1] sm:$0xff]  ;;  %s392_s1 = smov [#allocation2]   ;;  %s322_s3 = sshll.u32 %s512_s2, 4  ;;  %s323_s3 = int_to_ptr.hbm [resolvable:$true] %s322_s3 }
   0x6   :  { %v94_v20 = vand.u32 4294901760, %v93_v13  ;;  %159 = vmatpush.msra.mxu2 %v93_v13  ;;  %203 = vmatpush.msra.mxu3 %v427_v7  ;;  %v123_v22 = vsub.f32 %v30_v11, %v447_v15  ;;  %v129_v29 = vsub.f32 %v29_v12, %v449_v16  ;;  %v65_v46 = vand.u32 4294901760, %v28_v45  ;;  %s320_s28 = sshll.u32 %s392_s1, 4  ;;  %s393_s4 = smov 128   ;;  %s321_s28 = int_to_ptr.vmem [resolvable:$true] %s320_s28 }
   0x7   :  { %v100_v23 = vand.u32 4294901760, %v99_v17  ;;  %v106_v24 = vand.u32 4294901760, %v105_v18  ;;  %v457_v25 = vand.u32 4294901760, %v111_v19  ;;  %54 = vmatpush.msra.mxu0 %v427_v7  ;;  %v463_v28 = vand.u32 4294901760, %v117_v21  ;;  %s394_s5 = smov 8  }
   0x8   :  { %v95_v27 = vsub.f32 %v93_v13, %v94_v20  ;;  %162 = vmatpush.msra.mxu2 %v99_v17  ;;  %205 = vmatpush.msra.mxu3 %v429_v8  ;;  %v124_v34 = vand.u32 4294901760, %v123_v22  ;;  %v130_v38 = vand.u32 4294901760, %v129_v29  ;;  %v135_v47 = vsub.f32 %v28_v45, %v65_v46 }
   0x9   :  { %v101_v30 = vsub.f32 %v99_v17, %v100_v23  ;;  %v107_v31 = vsub.f32 %v105_v18, %v106_v24  ;;  %56 = vmatpush.msra.mxu0 %v429_v8  ;;  %v113_v33 = vsub.f32 %v111_v19, %v457_v25  ;;  %v119_v37 = vsub.f32 %v117_v21, %v463_v28 }
   0xa   :  { %v96_v32 = vand.u32 4294901760, %v95_v27  ;;  %165 = vmatpush.msra.mxu2 %v105_v18  ;;  %207 = vmatpush.msra.mxu3 %v431_v9  ;;  %v125_v40 = vsub.f32 %v123_v22, %v124_v34  ;;  %v131_v42 = vsub.f32 %v129_v29, %v130_v38  ;;  %v136_v48 = vand.u32 4294901760, %v135_v47 }
   0xb   :  { %20 = vperm.xlu0 %363, %v13_v26   ;;  %v102_v35 = vand.u32 4294901760, %v101_v30  ;;  %58 = vmatpush.msra.mxu0 %v431_v9  ;;  %v108_v36 = vand.u32 4294901760, %v107_v31  ;;  %v114_v39 = vand.u32 4294901760, %v113_v33  ;;  %v120_v41 = vand.u32 4294901760, %v119_v37 }
   0xc   :  { %97 = vmatpush.msra.mxu1 %v96_v32  ;;  %168 = vmatpush.msra.mxu2 %v111_v19  ;;  %v126_v43 = vand.u32 4294901760, %v125_v40  ;;  %v132_v44 = vand.u32 4294901760, %v131_v42  ;;  %v137_v49 = vsub.f32 %v135_v47, %v136_v48  ;;  %v14_v51 = vlaneseq }
   0xd   :  { %209 = vmatpush.msra.mxu3 %v444_v14  ;;  %60 = vmatpush.msra.mxu0 %v444_v14  ;;  %vm36_vm0 = vcmask 523264   ;;  %v391_v54 = vmov 0.0   ;;  %vm313_vm3 = vcmask 261120  }
   0xe   :  { %103 = vmatpush.msra.mxu1 %v102_v35  ;;  %171 = vmatpush.msra.mxu2 %v117_v21  ;;  %v138_v50 = vand.u32 4294901760, %v137_v49  ;;  %v15_v52 = vand.u32 127, %v14_v51 }
   0xf   :  { %211 = vmatpush.msra.mxu3 %v447_v15  ;;  %62 = vmatpush.msra.mxu0 %v447_v15 }
  0x10   :  { %109 = vmatpush.msra.mxu1 %v108_v36  ;;  %174 = vmatpush.msra.mxu2 %v123_v22 }
  0x11   :  { %213 = vmatpush.msra.mxu3 %v449_v16  ;;  %64 = vmatpush.msra.mxu0 %v449_v16 }
  0x12   :  { %115 = vmatpush.msra.mxu1 %v114_v39  ;;  %177 = vmatpush.msra.mxu2 %v129_v29 }
  0x13   :  { %215 = vmatpush.msra.mxu3 %v65_v46  ;;  %66 = vmatpush.msra.mxu0 %v65_v46 }
  0x14   :  { %121 = vmatpush.msra.mxu1 %v120_v41  ;;  %180 = vmatpush.msra.mxu2 %v135_v47 }
  0x15   :  { %350 = vmatpush.msrb.mxu3 %v416_v3  ;;  %240 = vmatpush.msrb.mxu0 %v94_v20 }
  0x16   :  { %127 = vmatpush.msra.mxu1 %v126_v43  ;;  %342 = vmatpush.msrb.mxu2 %v94_v20 }
  0x17   :  { %351 = vmatpush.msrb.mxu3 %v427_v7  ;;  %244 = vmatpush.msrb.mxu0 %v100_v23 }
  0x18   :  { %133 = vmatpush.msra.mxu1 %v132_v44  ;;  %343 = vmatpush.msrb.mxu2 %v100_v23 }
  0x19   :  { %352 = vmatpush.msrb.mxu3 %v429_v8  ;;  %248 = vmatpush.msrb.mxu0 %v106_v24 }
  0x1a   :  { %344 = vmatpush.msrb.mxu2 %v106_v24  ;;  %139 = vmatpush.msra.mxu1 %v138_v50 }
  0x1b   :  { %353 = vmatpush.msrb.mxu3 %v431_v9  ;;  %252 = vmatpush.msrb.mxu0 %v457_v25 }
  0x1c   :  { %287 = vmatpush.msrb.mxu1 %v416_v3  ;;  %345 = vmatpush.msrb.mxu2 %v457_v25 }
  0x1d   :  { %354 = vmatpush.msrb.mxu3 %v444_v14  ;;  %256 = vmatpush.msrb.mxu0 %v463_v28 }
  0x1e   :  { %289 = vmatpush.msrb.mxu1 %v427_v7  ;;  %346 = vmatpush.msrb.mxu2 %v463_v28 }
  0x1f   :  { %355 = vmatpush.msrb.mxu3 %v447_v15  ;;  %260 = vmatpush.msrb.mxu0 %v124_v34 }
  0x20   :  { %291 = vmatpush.msrb.mxu1 %v429_v8  ;;  %347 = vmatpush.msrb.mxu2 %v124_v34 }
  0x21   :  { %356 = vmatpush.msrb.mxu3 %v449_v16  ;;  %264 = vmatpush.msrb.mxu0 %v130_v38 }
  0x22   :  { %293 = vmatpush.msrb.mxu1 %v431_v9  ;;  %348 = vmatpush.msrb.mxu2 %v130_v38 }
  0x23   :  { %357 = vmatpush.msrb.mxu3 %v65_v46  ;;  %268 = vmatpush.msrb.mxu0 %v136_v48 }
  0x24   :  { %295 = vmatpush.msrb.mxu1 %v444_v14  ;;  %349 = vmatpush.msrb.mxu2 %v136_v48 }
  0x26   :  { %297 = vmatpush.msrb.mxu1 %v447_v15 }
  0x28   :  { %299 = vmatpush.msrb.mxu1 %v449_v16 }
  0x2a   :  { %301 = vmatpush.msrb.mxu1 %v65_v46 }
  0x74   :  { %v18_v53 = vpop.permute.xlu0 %17 }
  0x75   :  { %vm22_vm1 = vcmp.eq.s32.totalorder %v15_v52, %v18_v53 }
  0x76   :  { %v334_v55 = vsel %vm22_vm1, 1.0, %v391_v54 }
  0x77   :  { %336 = vmatmul.msk.f32.vlgmr.msra.gmra.mxu1 %vm36_vm0, %v334_v55  ;;  %v38_v56 = vsel %vm36_vm0, %v334_v55, 0 }
  0x78   :  { %v68_v57 = vsub.f32 %v38_v56, %v38_v56 }
  0x7a   :  { %183 = vmatmul.f32.vlgmr.msra.gmra.mxu2 %v68_v57  ;;  %v69_v58 = vand.u32 4294901760, %v68_v57 }
  0x7c   :  { %219 = vmatmul.f32.vlgmr.msra.gmra.mxu3 %v69_v58  ;;  %v70_v60 = vsub.f32 %v68_v57, %v69_v58 }
  0x7d   :  { %v21_v59 = vpop.permute.xlu0 %20 }
  0x7e   :  { %vm23_vm2 = vcmp.eq.s32.totalorder %v15_v52, %v21_v59  ;;  %v71_v62 = vand.u32 4294901760, %v70_v60 }
  0x7f   :  { %v335_v61 = vsel %vm23_vm2, 1.0, %v391_v54 }
  0x80   :  { %337 = vmatmul.msk.f32.gmra.mxu1 %vm36_vm0, %v335_v61  ;;  %v41_v63 = vsel %vm36_vm0, %v335_v61, 0  ;;  %72 = vmatmul.f32.vlgmr.msra.gmra.mxu0 %v71_v62 }
  0x81   :  { %v76_v0 = vsub.f32 %v41_v63, %v41_v63 }
  0x83   :  { %188 = vmatmul.f32.gmra.mxu2 %v76_v0  ;;  %v77_v1 = vand.u32 4294901760, %v76_v0 }
  0x85   :  { %225 = vmatmul.f32.gmra.mxu3 %v77_v1  ;;  %v78_v2 = vsub.f32 %v76_v0, %v77_v1 }
  0x87   :  { %v79_v3 = vand.u32 4294901760, %v78_v2 }
  0x88   :  { %340 = vmatmul.msk.f32.vlgmr.msrb.gmra.mxu1 %vm36_vm0, %v334_v55 }
  0x89   :  { %80 = vmatmul.f32.gmra.mxu0 %v79_v3 }
  0x8b   :  { %339 = vmatmul.msk.f32.vlgmr.msrb.gmra.mxu2 %vm36_vm0, %v335_v61 }
  0x8d   :  { %341 = vmatmul.msk.f32.vlgmr.msrb.gmra.mxu3 %vm36_vm0, %v335_v61 }
  0x91   :  { %338 = vmatmul.msk.f32.vlgmr.msrb.gmra.mxu0 %vm36_vm0, %v334_v55 }
  0xf4   :  { %v142_v4 = vpop.f32.mrf.mxu1 }
  0xfd   :  { %v73_v5 = vpop.f32.mrf.mxu0  ;;  %v184_v6 = vpop.f32.mrf.mxu2 }
  0xfe   :  { %v146_v8 = vpop.f32.mrf.mxu1  ;;  %v143_v9 = vadd.f32 %v142_v4, %v73_v5 }
  0xff   :  { %v220_v7 = vpop.f32.mrf.mxu3 }
 0x100   :  { %v185_v14 = vadd.f32 %v184_v6, %v143_v9 }
 0x102   :  { %v221_v16 = vadd.f32 %v220_v7, %v185_v14 }
 0x106   :  { %v81_v10 = vpop.f32.mrf.mxu0  ;;  %v189_v11 = vpop.f32.mrf.mxu2 }
 0x107   :  { %v147_v12 = vadd.f32 %v146_v8, %v81_v10  ;;  %v304_v22 = vpop.f32.mrf.mxu1 }
 0x108   :  { %v226_v13 = vpop.f32.mrf.mxu3 }
 0x109   :  { %v190_v15 = vadd.f32 %v189_v11, %v147_v12 }
 0x10b   :  { %v227_v17 = vadd.f32 %v226_v13, %v190_v15 }
 0x10e   :  { %v271_v18 = vpop.f32.mrf.mxu0  ;;  %v275_v19 = vpop.f32.mrf.mxu2 }
 0x10f   :  { %v272_v20 = vadd.f32 %v271_v18, %v221_v16  ;;  %v276_v21 = vadd.f32 %v275_v19, %v227_v17 }
 0x110   :  { %v308_v23 = vpop.f32.mrf.mxu3 }
 0x111   :  { %v305_v24 = vadd.f32 %v304_v22, %v272_v20  ;;  %v309_v25 = vadd.f32 %v308_v23, %v276_v21 }
 0x113   :  { %v311_v26 = vmul.f32 5.656854, %v305_v24  ;;  %v312_v27 = vmul.f32 5.656854, %v309_v25 }
 0x115   :  { %314 = vst.msk [vmem:[#allocation2] sm:$0xff] %vm313_vm3, %v311_v26 }
 0x116   :  { %315 = vst.msk [vmem:[#allocation2 + $0x8] sm:$0xff] %vm313_vm3, %v312_v27 }
 0x117   :  { %328 = dma.vmem_to_hbm [thread:$0]  %s321_s28, 256, %s323_s3, [#allocation3], %s393_s4, %s393_s4, %s394_s5  }
 0x118   :  { %388 = dma.done.wait [#allocation3], 256  }
 0x119   :  { %389 = vsyncadd [#allocation3], 4294967040 }
 0x11a   :  { %333 = vsyncpa [#allocation3], 1 }

</bundles_post_ra>
